<compile_context>
chip_gen: v5e
topology: v5e:2x2
jax: 0.10.0
libtpu: 0.0.40
codegen_flags: <defaults>
</compile_context>

<pallas_src>
import functools

import jax
import jax.numpy as jnp
from jax import lax
from jax.experimental import pallas as pl
from jax.experimental.pallas import tpu as pltpu

HIDDEN_DIM = 50
INPUT_DIM = 1
OUTPUT_DIM = 1
LANE = 128
CHUNK = 256  # lanes of batch processed per inner-loop iteration (bounds vreg pressure)


def mlp_kernel(x_ref, w1_ref, b1_ref, w2_ref, b2_ref, w3_ref, b3_ref, o_ref):
    # Transposed layout: batch on lanes.
    #   x_ref  : (INPUT_DIM=1, TILE_B)
    #   w1_ref : (H, 1)   b1_ref : (H, 1)
    #   w2_ref : (H, H)   b2_ref : (H, 1)
    #   w3_ref : (H, 1)   b3_ref : (1, 1)
    #   o_ref  : (OUTPUT_DIM=1, TILE_B)

    # Hoist constant (weight/bias) loads once per grid step; the chunk loop below
    # closes over them so they are not re-loaded / re-broadcast per iteration.
    w1 = w1_ref[...]                      # (H, 1)
    b1 = b1_ref[...]                      # (H, 1)
    w2 = w2_ref[...]                      # (H, H)
    b2 = b2_ref[...]                      # (H, 1)
    w3 = w3_ref[...]                      # (H, 1)
    b3 = b3_ref[...]                      # (1, 1)

    tile_b = x_ref.shape[1]               # static
    chunk = CHUNK if tile_b % CHUNK == 0 else LANE
    num_chunks = tile_b // chunk          # static

    def chunk_body(c, carry):
        start = pl.multiple_of(c * chunk, LANE)
        x_c = x_ref[:, pl.ds(start, chunk)]                          # (1, chunk)

        # Layer 1: K=1 "matmul" -> VPU broadcast multiply (no MXU push).
        h1 = jnp.maximum(w1 * x_c + b1, 0.0)                         # (H, chunk)

        # Layer 2: (H,H) @ (H,chunk) -> MXU matmul, lane-dense N.
        h2 = jnp.dot(w2, h1, preferred_element_type=jnp.float32)
        h2 = jnp.maximum(h2 + b2, 0.0)                               # (H, chunk)

        # Layer 3: M=1 in this layout -> VPU multiply + sublane reduce (XLU),
        # avoiding a second MXU round-trip; result stays lane-dense.
        out = jnp.sum(h2 * w3, axis=0, keepdims=True) + b3           # (1, chunk)

        o_ref[:, pl.ds(start, chunk)] = out.astype(o_ref.dtype)
        return carry

    lax.fori_loop(0, num_chunks, chunk_body, 0, unroll=True)


def nonlinear_regression_forward(x, params, tile_b=8192):
    """x: (batch, INPUT_DIM) float32. params: dict with PyTorch-oriented shapes."""
    batch = x.shape[0]

    # Lane-dense batch tiling: tile is a multiple of 128.
    padded_min = max(LANE, ((batch + LANE - 1) // LANE) * LANE)
    tile_b = max(LANE, (min(tile_b, padded_min) // LANE) * LANE)

    # Keep >= 2 parallel tiles whenever the batch allows it, so both v7x
    # TensorCores get work through the "parallel" grid axis.
    if padded_min >= 2 * LANE:
        half = max(LANE, ((padded_min // 2) // LANE) * LANE)
        tile_b = min(tile_b, half)

    padded = ((batch + tile_b - 1) // tile_b) * tile_b
    num_tiles = padded // tile_b

    # (batch, 1) -> (1, batch) is a pure reshape (no data movement) since INPUT_DIM=1.
    x_flat = x.reshape(INPUT_DIM, batch)
    if padded != batch:
        # TODO(synk): a masked partial last block would avoid this pad copy entirely.
        x_flat = jnp.pad(x_flat, ((0, 0), (0, padded - batch)))

    # Wrapper-side layout plumbing (cheap, constants): feature-major weights.
    w1_t = params["w1"].T                         # (H, 1)
    b1_t = params["b1"].T                         # (H, 1)
    w2_t = params["w2"].T                         # (H, H)
    b2_t = params["b2"].T                         # (H, 1)
    w3 = params["w3"]                             # (H, 1)
    b3 = params["b3"]                             # (1, 1)

    resident = lambda shape: pl.BlockSpec(shape, lambda i: (0,) * len(shape))

    cost = pl.CostEstimate(
        flops=2 * padded * (HIDDEN_DIM * HIDDEN_DIM + 2 * HIDDEN_DIM),
        transcendentals=0,
        bytes_accessed=4 * padded * (INPUT_DIM + OUTPUT_DIM)
        + 4 * (HIDDEN_DIM * HIDDEN_DIM + 3 * HIDDEN_DIM + OUTPUT_DIM + 1),
    )

    out_t = pl.pallas_call(
        mlp_kernel,
        out_shape=jax.ShapeDtypeStruct((OUTPUT_DIM, padded), jnp.float32),
        grid_spec=pltpu.PrefetchScalarGridSpec(
            num_scalar_prefetch=0,
            grid=(num_tiles,),
            in_specs=[
                # Batch-tiled, double-buffered stream of x (lane-dense).
                pl.BlockSpec((INPUT_DIM, tile_b), lambda i: (0, i)),
                # Weights/biases: constant index maps -> stay resident in VMEM.
                resident(w1_t.shape), resident(b1_t.shape),
                resident(w2_t.shape), resident(b2_t.shape),
                resident(w3.shape), resident(b3.shape),
            ],
            out_specs=pl.BlockSpec((OUTPUT_DIM, tile_b), lambda i: (0, i)),
        ),
        compiler_params=pltpu.CompilerParams(
            # Batch tiles are independent -> shard across TCs on v7x.
            dimension_semantics=("parallel",),
        ),
        cost_estimate=cost,
    )(x_flat, w1_t, b1_t, w2_t, b2_t, w3, b3)

    # (1, padded) -> (batch, 1) via reshape + slice (no transpose copy).
    return out_t.reshape(padded, OUTPUT_DIM)[:batch]


def init_params(key):
    """Deterministic init mimicking nn.Linear's U(-1/sqrt(fan_in), 1/sqrt(fan_in))."""
    ks = jax.random.split(key, 6)

    def uniform(k, shape, fan_in):
        bound = 1.0 / jnp.sqrt(jnp.float32(fan_in))
        return jax.random.uniform(k, shape, jnp.float32, -bound, bound)

    return {
        "w1": uniform(ks[0], (INPUT_DIM, HIDDEN_DIM), INPUT_DIM),
        "b1": uniform(ks[1], (1, HIDDEN_DIM), INPUT_DIM),
        "w2": uniform(ks[2], (HIDDEN_DIM, HIDDEN_DIM), HIDDEN_DIM),
        "b2": uniform(ks[3], (1, HIDDEN_DIM), HIDDEN_DIM),
        "w3": uniform(ks[4], (HIDDEN_DIM, OUTPUT_DIM), HIDDEN_DIM),
        "b3": uniform(ks[5], (1, OUTPUT_DIM), HIDDEN_DIM),
    }


def reference_forward(x, p):
    h1 = jnp.maximum(x @ p["w1"] + p["b1"], 0.0)
    h2 = jnp.maximum(h1 @ p["w2"] + p["b2"], 0.0)
    return h2 @ p["w3"] + p["b3"]


if __name__ == "__main__":
    key = jax.random.PRNGKey(0)
    pkey, xkey1, xkey2 = jax.random.split(key, 3)

    params = init_params(pkey)
    fwd = jax.jit(functools.partial(nonlinear_regression_forward, tile_b=8192))

    # Small test (single 128-lane tile, single chunk).
    batch1 = 8
    x1 = jax.random.normal(xkey1, (batch1, INPUT_DIM), jnp.float32)
    out1 = jax.block_until_ready(fwd(x1, params))
    ref1 = reference_forward(x1, params)
    assert out1.shape == (batch1, OUTPUT_DIM)
    assert jnp.allclose(out1, ref1, atol=1e-5, rtol=1e-5)

    # Larger test: exercises multi-tile grid, batch padding, and the chunked inner loop.
    batch2 = 600
    x2 = jax.random.normal(xkey2, (batch2, INPUT_DIM), jnp.float32)
    out2 = jax.block_until_ready(fwd(x2, params))
    ref2 = reference_forward(x2, params)
    assert out2.shape == (batch2, OUTPUT_DIM)
    assert jnp.allclose(out2, ref2, atol=1e-5, rtol=1e-5)

    print("KERNEL_OK")
</pallas_src>

<mosaic_0001>
module attributes {stable_mosaic.version = 11 : i64} {
  func.func @mlp_kernel(%arg0: i32, %arg1: memref<1x128xf32, #tpu.memory_space<vmem>>, %arg2: memref<50x1xf32, #tpu.memory_space<vmem>>, %arg3: memref<50x1xf32, #tpu.memory_space<vmem>>, %arg4: memref<50x50xf32, #tpu.memory_space<vmem>>, %arg5: memref<50x1xf32, #tpu.memory_space<vmem>>, %arg6: memref<50x1xf32, #tpu.memory_space<vmem>>, %arg7: memref<1x1xf32, #tpu.memory_space<vmem>>, %arg8: memref<1x128xf32, #tpu.memory_space<vmem>>) attributes {dimension_semantics = [#tpu.dimension_semantics<parallel>], iteration_bounds = array<i64: 1>, scalar_prefetch = 0 : i64, scratch_operands = 0 : i64, tpu.core_type = #tpu.core_type<tc>, window_params = [{transform_indices = @transform_0, window_bounds = array<i64: 1, 128>}, {pipeline_mode = #tpu.pipeline_mode<synchronous>, transform_indices = @transform_1, window_bounds = array<i64: 50, 1>}, {pipeline_mode = #tpu.pipeline_mode<synchronous>, transform_indices = @transform_2, window_bounds = array<i64: 50, 1>}, {pipeline_mode = #tpu.pipeline_mode<synchronous>, transform_indices = @transform_3, window_bounds = array<i64: 50, 50>}, {pipeline_mode = #tpu.pipeline_mode<synchronous>, transform_indices = @transform_4, window_bounds = array<i64: 50, 1>}, {pipeline_mode = #tpu.pipeline_mode<synchronous>, transform_indices = @transform_5, window_bounds = array<i64: 50, 1>}, {pipeline_mode = #tpu.pipeline_mode<synchronous>, transform_indices = @transform_6, window_bounds = array<i64: 1, 1>}, {transform_indices = @transform_7, window_bounds = array<i64: 1, 128>}]} {
    %c0 = arith.constant 0 : index
    %c0_0 = arith.constant 0 : index
    %0 = vector.load %arg2[%c0, %c0_0] : memref<50x1xf32, #tpu.memory_space<vmem>>, vector<50x1xf32>
    %c0_1 = arith.constant 0 : index
    %c0_2 = arith.constant 0 : index
    %1 = vector.load %arg3[%c0_1, %c0_2] : memref<50x1xf32, #tpu.memory_space<vmem>>, vector<50x1xf32>
    %c0_3 = arith.constant 0 : index
    %c0_4 = arith.constant 0 : index
    %2 = vector.load %arg4[%c0_3, %c0_4] : memref<50x50xf32, #tpu.memory_space<vmem>>, vector<50x50xf32>
    %c0_5 = arith.constant 0 : index
    %c0_6 = arith.constant 0 : index
    %3 = vector.load %arg5[%c0_5, %c0_6] : memref<50x1xf32, #tpu.memory_space<vmem>>, vector<50x1xf32>
    %c0_7 = arith.constant 0 : index
    %c0_8 = arith.constant 0 : index
    %4 = vector.load %arg6[%c0_7, %c0_8] : memref<50x1xf32, #tpu.memory_space<vmem>>, vector<50x1xf32>
    %c0_9 = arith.constant 0 : index
    %c0_10 = arith.constant 0 : index
    %5 = vector.load %arg7[%c0_9, %c0_10] : memref<1x1xf32, #tpu.memory_space<vmem>>, vector<1x1xf32>
    %c0_i32 = arith.constant 0 : i32
    %c128_i32 = arith.constant 128 : i32
    %6 = arith.muli %c0_i32, %c128_i32 : i32
    %7 = tpu.assume_multiple %6, 128 : i32
    %c0_11 = arith.constant 0 : index
    %8 = arith.index_cast %7 : i32 to index
    %9 = vector.load %arg1[%c0_11, %8] : memref<1x128xf32, #tpu.memory_space<vmem>>, vector<1x128xf32>
    %10 = vector.broadcast %0 : vector<50x1xf32> to vector<50x128xf32>
    %11 = vector.broadcast %9 : vector<1x128xf32> to vector<50x128xf32>
    %12 = arith.mulf %10, %11 : vector<50x128xf32>
    %13 = vector.broadcast %1 : vector<50x1xf32> to vector<50x128xf32>
    %14 = arith.addf %12, %13 : vector<50x128xf32>
    %cst = arith.constant 0.000000e+00 : f32
    %15 = vector.broadcast %cst : f32 to vector<50x128xf32>
    %16 = arith.maximumf %14, %15 : vector<50x128xf32>
    %cst_12 = arith.constant dense<0.000000e+00> : vector<50x128xf32>
    %17 = tpu.matmul %2, %16, %cst_12 {dimension_numbers = #tpu.dot_dimension_numbers<[1], [0], [0], [1], [0, 0, 1, 1], [], []>} : vector<50x50xf32>, vector<50x128xf32>, vector<50x128xf32> -> vector<50x128xf32>
    %18 = vector.broadcast %3 : vector<50x1xf32> to vector<50x128xf32>
    %19 = arith.addf %17, %18 : vector<50x128xf32>
    %cst_13 = arith.constant 0.000000e+00 : f32
    %20 = vector.broadcast %cst_13 : f32 to vector<50x128xf32>
    %21 = arith.maximumf %19, %20 : vector<50x128xf32>
    %22 = vector.broadcast %4 : vector<50x1xf32> to vector<50x128xf32>
    %23 = arith.mulf %21, %22 : vector<50x128xf32>
    %cst_14 = arith.constant dense<0.000000e+00> : vector<128xf32>
    %24 = vector.multi_reduction <add>, %23, %cst_14 [0] : vector<50x128xf32> to vector<128xf32>
    %25 = vector.shape_cast %24 : vector<128xf32> to vector<1x128xf32>
    %26 = vector.broadcast %5 : vector<1x1xf32> to vector<1x128xf32>
    %27 = arith.addf %25, %26 : vector<1x128xf32>
    %c0_15 = arith.constant 0 : index
    %28 = arith.index_cast %7 : i32 to index
    %29 = vector.load %arg8[%c0_15, %28] : memref<1x128xf32, #tpu.memory_space<vmem>>, vector<1x128xf32>
    tpu.vector_store %arg8[%c0_15, %28], %27 {strides = array<i32>} : memref<1x128xf32, #tpu.memory_space<vmem>>, vector<1x128xf32>,
    %c1_i32 = arith.constant 1 : i32
    return
  }
  func.func @transform_0(%arg0: i32) -> (i32, i32) {
    %c0_i32 = arith.constant 0 : i32
    %c0_i32_0 = arith.constant 0 : i32
    return %c0_i32, %arg0 : i32, i32
  }
  func.func @transform_1(%arg0: i32) -> (i32, i32) {
    %c0_i32 = arith.constant 0 : i32
    %c0_i32_0 = arith.constant 0 : i32
    %c0_i32_1 = arith.constant 0 : i32
    return %c0_i32, %c0_i32_0 : i32, i32
  }
  func.func @transform_2(%arg0: i32) -> (i32, i32) {
    %c0_i32 = arith.constant 0 : i32
    %c0_i32_0 = arith.constant 0 : i32
    %c0_i32_1 = arith.constant 0 : i32
    return %c0_i32, %c0_i32_0 : i32, i32
  }
  func.func @transform_3(%arg0: i32) -> (i32, i32) {
    %c0_i32 = arith.constant 0 : i32
    %c0_i32_0 = arith.constant 0 : i32
    %c0_i32_1 = arith.constant 0 : i32
    return %c0_i32, %c0_i32_0 : i32, i32
  }
  func.func @transform_4(%arg0: i32) -> (i32, i32) {
    %c0_i32 = arith.constant 0 : i32
    %c0_i32_0 = arith.constant 0 : i32
    %c0_i32_1 = arith.constant 0 : i32
    return %c0_i32, %c0_i32_0 : i32, i32
  }
  func.func @transform_5(%arg0: i32) -> (i32, i32) {
    %c0_i32 = arith.constant 0 : i32
    %c0_i32_0 = arith.constant 0 : i32
    %c0_i32_1 = arith.constant 0 : i32
    return %c0_i32, %c0_i32_0 : i32, i32
  }
  func.func @transform_6(%arg0: i32) -> (i32, i32) {
    %c0_i32 = arith.constant 0 : i32
    %c0_i32_0 = arith.constant 0 : i32
    %c0_i32_1 = arith.constant 0 : i32
    return %c0_i32, %c0_i32_0 : i32, i32
  }
  func.func @transform_7(%arg0: i32) -> (i32, i32) {
    %c0_i32 = arith.constant 0 : i32
    %c0_i32_0 = arith.constant 0 : i32
    return %c0_i32, %arg0 : i32, i32
  }
}

</mosaic_0001>

<bundles_post_ra>
// kernel: nonlinear_regression_forward.1
= control target key start
LH: loop header
LB: loop body
LE: loop exit
PB: predicated region body
PF: predicated region fallthrough
CT: control target
= control target key end

     0   :  { %v366_v0 = vmov 0   ;;  %vm216_vm0 = vcmask 1041408   ;;  %vm194_vm1 = vcmask 408576   ;;  %s533_s2 = inlined_call_operand.vmem [shape: f32[50,1], index: 2, kind: input, shape index: {}]   ;;  %s534_s1 = inlined_call_operand.vmem [shape: f32[50,1], index: 1, kind: input, shape index: {}]   ;;  %s535_s0 = inlined_call_operand.vmem [shape: f32[1,128], index: 0, kind: input, shape index: {}]   ;;  %s536_s4 = inlined_call_operand.vmem [shape: f32[50,1], index: 4, kind: input, shape index: {}]   ;;  %s537_s6 = inlined_call_operand.<no memory space> [shape: f32[1,1], index: 6, kind: input, shape index: {}]   ;;  %s538_s5 = inlined_call_operand.vmem [shape: f32[50,1], index: 5, kind: input, shape index: {}]   ;;  %s539_s3 = inlined_call_operand.vmem [shape: f32[50,50], index: 3, kind: input, shape index: {}]   ;;  %s540_s7 = inlined_call_operand.vmem [shape: f32[1,128], index: 7, kind: output, shape index: {}]  }
   0x1   :  { %364 = vset.pattern.permute.xlu2 %v366_v0  ;;  %363 = vset.pattern.permute.xlu1 %v366_v0  ;;  %v41_v1 = vld [vmem:[%s533_s2 + $0x30] sm:$0x3]  ;;  %v40_v2 = vld [vmem:[%s533_s2 + $0x28] sm:$0xff]  ;;  %v32_v4 = vld [vmem:[%s534_s1 + $0x20] sm:$0xff]  ;;  %v12_v16 = vstv %s537_s6 }
   0x2   :  { %v34_v3 = vld [vmem:[%s534_s1 + $0x30] sm:$0x3]  ;;  %362 = vset.pattern.permute.xlu0 %v366_v0  ;;  %142 = vperm.xlu1 %363, %v41_v1   ;;  %v33_v5 = vld [vmem:[%s534_s1 + $0x28] sm:$0xff]  ;;  %v31_v6 = vld [vmem:[%s534_s1 + $0x18] sm:$0xff]  ;;  %13 = vst [vmem:[#allocation2] sm:$0x1] %v12_v16 }
   0x3   :  { %137 = vperm.xlu2 %364, %v40_v2   ;;  %97 = vperm.xlu0 %362, %v34_v3   ;;  %v30_v7 = vld [vmem:[%s534_s1 + $0x10] sm:$0xff]  ;;  %v39_v8 = vld [vmem:[%s533_s2 + $0x20] sm:$0xff]  ;;  %v38_v9 = vld [vmem:[%s533_s2 + $0x18] sm:$0xff] }
   0x4   :  { %v37_v10 = vld [vmem:[%s533_s2 + $0x10] sm:$0xff]  ;;  %v29_v11 = vld [vmem:[%s534_s1 + $0x8] sm:$0xff]  ;;  %v28_v12 = vld [vmem:[%s534_s1] sm:$0xff] }
   0x5   :  { %v35_v13 = vld [vmem:[%s533_s2] sm:$0xff]  ;;  %v36_v14 = vld [vmem:[%s533_s2 + $0x8] sm:$0xff]  ;;  %v51_v17 = vld [vmem:[%s536_s4 + $0x10] sm:$0xff] }
   0x6   :  { %v49_v15 = vld [vmem:[%s536_s4] sm:$0xff]  ;;  %v50_v18 = vld [vmem:[%s536_s4 + $0x8] sm:$0xff]  ;;  %v52_v19 = vld [vmem:[%s536_s4 + $0x18] sm:$0xff] }
   0x7   :  { %v57_v20 = vld [vmem:[%s538_s5 + $0x8] sm:$0xff]  ;;  %v56_v21 = vld [vmem:[%s538_s5] sm:$0xff]  ;;  %v58_v24 = vld [vmem:[%s538_s5 + $0x10] sm:$0xff] }
   0x8   :  { %v53_v22 = vld [vmem:[%s536_s4 + $0x20] sm:$0xff]  ;;  %v54_v23 = vld [vmem:[%s536_s4 + $0x28] sm:$0xff]  ;;  %v59_v25 = vld [vmem:[%s538_s5 + $0x18] sm:$0xff] }
   0x9   :  { %v60_v26 = vld [vmem:[%s538_s5 + $0x20] sm:$0xff]  ;;  %v55_v27 = vld [vmem:[%s536_s4 + $0x30] sm:$0x3]  ;;  %v61_v28 = vld [vmem:[%s538_s5 + $0x28] sm:$0xff] }
   0xa   :  { %87 = vperm.xlu1 %363, %v32_v4   ;;  %v63_v29 = vld [vmem:[#allocation2] sm:$0x1]  ;;  %v62_v30 = vld [vmem:[%s538_s5 + $0x30] sm:$0x3]  ;;  %v43_v4 = vld [vmem:[%s539_s3 + $0x8] sm:$0xff] }
   0xb   :  { %92 = vperm.xlu0 %362, %v33_v5   ;;  %82 = vperm.xlu2 %364, %v31_v6   ;;  %v365_v32 = vld [vmem:[%s535_s0] ss:$0 sm:$0xff]  ;;  %v45_v5 = vld [vmem:[%s539_s3 + $0x18] sm:$0xff]  ;;  %v47_v6 = vld [vmem:[%s539_s3 + $0x28] sm:$0xff] }
   0xc   :  { %v42_v3 = vld [vmem:[%s539_s3] sm:$0xff] }
  0x12   :  { %77 = vperm.xlu1 %363, %v30_v7   ;;  %v44_v7 = vld [vmem:[%s539_s3 + $0x10] sm:$0xff] }
  0x13   :  { %132 = vperm.xlu0 %362, %v39_v8   ;;  %127 = vperm.xlu2 %364, %v38_v9   ;;  %v46_v8 = vld [vmem:[%s539_s3 + $0x20] sm:$0xff]  ;;  %v48_v9 = vld [vmem:[%s539_s3 + $0x30] sm:$0x3] }
  0x1a   :  { %122 = vperm.xlu1 %363, %v37_v10  }
  0x1b   :  { %72 = vperm.xlu0 %362, %v29_v11   ;;  %67 = vperm.xlu2 %364, %v28_v12  }
  0x22   :  { %112 = vperm.xlu1 %363, %v35_v13  }
  0x23   :  { %117 = vperm.xlu0 %362, %v36_v14   ;;  %161 = vperm.xlu2 %364, %v49_v15  }
  0x2a   :  { %171 = vperm.xlu1 %363, %v51_v17  }
  0x2b   :  { %166 = vperm.xlu0 %362, %v50_v18   ;;  %176 = vperm.xlu2 %364, %v52_v19  }
  0x32   :  { %272 = vperm.xlu1 %363, %v57_v20  }
  0x33   :  { %267 = vperm.xlu0 %362, %v56_v21   ;;  %181 = vperm.xlu2 %364, %v53_v22  }
  0x3a   :  { %186 = vperm.xlu1 %363, %v54_v23  }
  0x3b   :  { %277 = vperm.xlu0 %362, %v58_v24   ;;  %282 = vperm.xlu2 %364, %v59_v25  }
  0x42   :  { %287 = vperm.xlu1 %363, %v60_v26  }
  0x43   :  { %191 = vperm.xlu0 %362, %v55_v27   ;;  %292 = vperm.xlu2 %364, %v61_v28  }
  0x4a   :  { %322 = vperm.xlu1 %363, %v63_v29  }
  0x4b   :  { %297 = vperm.xlu0 %362, %v62_v30  }
  0x5d   :  { %v138_v31 = vpop.permute.xlu2 %137 }
  0x65   :  { %v83_v38 = vpop.permute.xlu2 %82 }
  0x66   :  { %v106_v43 = vmul.f32 %v365_v32, %v83_v38 }
  0x6d   :  { %v128_v47 = vpop.permute.xlu2 %127 }
  0x6e   :  { %v148_v49 = vadd.f32 %v128_v47, %v106_v43 }
  0x70   :  { %v155_v52 = vmax.f32 %v148_v49, 0.0 }
  0x74   :  { %v143_v33 = vpop.permute.xlu1 %142 }
  0x75   :  { %v98_v34 = vpop.permute.xlu0 %97  ;;  %v68_v58 = vpop.permute.xlu2 %67 }
  0x76   :  { %v109_v35 = vmul.f32 %v365_v32, %v98_v34  ;;  %v103_v59 = vmul.f32 %v365_v32, %v68_v58 }
  0x78   :  { %v151_v36 = vadd.f32 %v143_v33, %v109_v35 }
  0x7a   :  { %v158_v37 = vmax.f32 %v151_v36, 0.0 }
  0x7c   :  { %332 = vmatpush.msk.msra.mxu0 %vm216_vm0, %v158_v37  ;;  %340 = vmatpush.msk.msra.mxu1 %vm216_vm0, %v158_v37  ;;  %v88_v39 = vpop.permute.xlu1 %87 }
  0x7d   :  { %341 = vmatpush.msk.msra.mxu2 %vm216_vm0, %v158_v37  ;;  %342 = vmatpush.msk.msra.mxu3 %vm216_vm0, %v158_v37  ;;  %v93_v40 = vpop.permute.xlu0 %92  ;;  %v107_v45 = vmul.f32 %v365_v32, %v88_v39  ;;  %v162_v11 = vpop.permute.xlu2 %161 }
  0x7e   :  { %v108_v41 = vmul.f32 %v365_v32, %v93_v40 }
  0x80   :  { %v150_v42 = vadd.f32 %v138_v31, %v108_v41 }
  0x82   :  { %v157_v44 = vmax.f32 %v150_v42, 0.0 }
  0x84   :  { %230 = vmatpush.msra.mxu0 %v157_v44  ;;  %343 = vmatpush.msra.mxu1 %v157_v44  ;;  %v78_v46 = vpop.permute.xlu1 %77 }
  0x85   :  { %344 = vmatpush.msra.mxu2 %v157_v44  ;;  %345 = vmatpush.msra.mxu3 %v157_v44  ;;  %v133_v48 = vpop.permute.xlu0 %132  ;;  %v105_v53 = vmul.f32 %v365_v32, %v78_v46  ;;  %v177_v14 = vpop.permute.xlu2 %176 }
  0x86   :  { %v149_v50 = vadd.f32 %v133_v48, %v107_v45 }
  0x88   :  { %v156_v51 = vmax.f32 %v149_v50, 0.0 }
  0x8a   :  { %231 = vmatpush.msra.mxu0 %v156_v51  ;;  %346 = vmatpush.msra.mxu1 %v156_v51 }
  0x8b   :  { %347 = vmatpush.msra.mxu2 %v156_v51  ;;  %348 = vmatpush.msra.mxu3 %v156_v51 }
  0x8c   :  { %232 = vmatpush.msra.mxu0 %v155_v52  ;;  %349 = vmatpush.msra.mxu1 %v155_v52  ;;  %v123_v54 = vpop.permute.xlu1 %122 }
  0x8d   :  { %350 = vmatpush.msra.mxu2 %v155_v52  ;;  %351 = vmatpush.msra.mxu3 %v155_v52  ;;  %v147_v55 = vadd.f32 %v123_v54, %v105_v53  ;;  %v73_v56 = vpop.permute.xlu0 %72  ;;  %v182_v19 = vpop.permute.xlu2 %181 }
  0x8e   :  { %v104_v60 = vmul.f32 %v365_v32, %v73_v56 }
  0x8f   :  { %v154_v57 = vmax.f32 %v147_v55, 0.0 }
  0x91   :  { %233 = vmatpush.msra.mxu0 %v154_v57  ;;  %352 = vmatpush.msra.mxu1 %v154_v57 }
  0x92   :  { %353 = vmatpush.msra.mxu2 %v154_v57  ;;  %354 = vmatpush.msra.mxu3 %v154_v57 }
  0x94   :  { %v113_v61 = vpop.permute.xlu1 %112 }
  0x95   :  { %v118_v62 = vpop.permute.xlu0 %117  ;;  %v145_v63 = vadd.f32 %v113_v61, %v103_v59  ;;  %v283_v33 = vpop.permute.xlu2 %282 }
  0x96   :  { %v146_v0 = vadd.f32 %v118_v62, %v104_v60 }
  0x97   :  { %v152_v2 = vmax.f32 %v145_v63, 0.0 }
  0x98   :  { %v153_v1 = vmax.f32 %v146_v0, 0.0 }
  0x9a   :  { %234 = vmatpush.msra.mxu0 %v153_v1  ;;  %355 = vmatpush.msra.mxu1 %v153_v1 }
  0x9b   :  { %356 = vmatpush.msra.mxu2 %v153_v1  ;;  %357 = vmatpush.msra.mxu3 %v153_v1 }
  0x9c   :  { %235 = vmatpush.msra.mxu0 %v152_v2  ;;  %358 = vmatpush.msra.mxu1 %v152_v2  ;;  %v172_v12 = vpop.permute.xlu1 %171 }
  0x9d   :  { %359 = vmatpush.msra.mxu2 %v152_v2  ;;  %360 = vmatpush.msra.mxu3 %v152_v2  ;;  %v167_v10 = vpop.permute.xlu0 %166  ;;  %v293_v52 = vpop.permute.xlu2 %292 }
  0x9e   :  { %333 = vmatmul.msk.f32.vlgmr.msra.gmra.mxu0 %vm194_vm1, %v42_v3  ;;  %334 = vmatmul.msk.f32.vlgmr.msra.gmra.mxu1 %vm194_vm1, %v43_v4 }
  0x9f   :  { %336 = vmatmul.msk.f32.vlgmr.msra.gmra.mxu2 %vm194_vm1, %v45_v5  ;;  %338 = vmatmul.msk.f32.vlgmr.msra.gmra.mxu3 %vm194_vm1, %v47_v6 }
  0xa4   :  { %v273_v15 = vpop.permute.xlu1 %272 }
  0xa5   :  { %v268_v13 = vpop.permute.xlu0 %267 }
  0xa6   :  { %335 = vmatmul.msk.f32.gmra.mxu1 %vm194_vm1, %v44_v7 }
  0xa7   :  { %337 = vmatmul.msk.f32.gmra.mxu2 %vm194_vm1, %v46_v8  ;;  %339 = vmatmul.msk.f32.gmra.mxu3 %vm194_vm1, %v48_v9 }
  0xac   :  { %v187_v27 = vpop.permute.xlu1 %186 }
  0xad   :  { %v278_v16 = vpop.permute.xlu0 %277 }
  0xb4   :  { %v288_v48 = vpop.permute.xlu1 %287 }
  0xb5   :  { %v192_v29 = vpop.permute.xlu0 %191 }
  0xbc   :  { %v323_v63 = vpop.permute.xlu1 %322 }
  0xbd   :  { %v298_v49 = vpop.permute.xlu0 %297  ;;  %v325_v1 = vperm.slane %v323_v63, 0 }
 0x11b   :  { %v237_v17 = vpop.f32.mrf.mxu0  ;;  %v240_v18 = vpop.f32.mrf.mxu1 }
 0x11c   :  { %v238_v20 = vadd.f32 %v237_v17, %v162_v11  ;;  %v241_v21 = vadd.f32 %v240_v18, %v167_v10 }
 0x11e   :  { %v258_v22 = vmax.f32 %v238_v20, 0.0  ;;  %v259_v23 = vmax.f32 %v241_v21, 0.0 }
 0x120   :  { %v300_v30 = vmul.f32 %v268_v13, %v258_v22  ;;  %v301_v31 = vmul.f32 %v273_v15, %v259_v23 }
 0x122   :  { %v246_v24 = vpop.f32.mrf.mxu2  ;;  %v252_v25 = vpop.f32.mrf.mxu3  ;;  %v307_v36 = vadd.f32 %v301_v31, %v300_v30 }
 0x123   :  { %v243_v26 = vpop.f32.mrf.mxu1  ;;  %v247_v32 = vadd.f32 %v246_v24, %v177_v14  ;;  %v253_v38 = vadd.f32 %v252_v25, %v187_v27 }
 0x124   :  { %v244_v28 = vadd.f32 %v243_v26, %v172_v12 }
 0x125   :  { %v261_v37 = vmax.f32 %v247_v32, 0.0  ;;  %v263_v45 = vmax.f32 %v253_v38, 0.0 }
 0x126   :  { %v260_v34 = vmax.f32 %v244_v28, 0.0 }
 0x127   :  { %v303_v44 = vmul.f32 %v283_v33, %v261_v37  ;;  %v305_v54 = vmul.f32 %v293_v52, %v263_v45 }
 0x128   :  { %v302_v35 = vmul.f32 %v278_v16, %v260_v34 }
 0x12a   :  { %v249_v39 = vpop.f32.mrf.mxu2  ;;  %v255_v40 = vpop.f32.mrf.mxu3  ;;  %v308_v41 = vadd.f32 %v307_v36, %v302_v35 }
 0x12b   :  { %v250_v42 = vadd.f32 %v249_v39, %v182_v19  ;;  %v256_v43 = vadd.f32 %v255_v40, %v192_v29 }
 0x12c   :  { %v309_v51 = vadd.f32 %v308_v41, %v303_v44 }
 0x12d   :  { %v262_v46 = vmax.f32 %v250_v42, 0.0  ;;  %v264_v47 = vmax.f32 %v256_v43, 0.0 }
 0x12f   :  { %v304_v50 = vmul.f32 %v288_v48, %v262_v46  ;;  %v306_v53 = vmul.f32 %v298_v49, %v264_v47 }
 0x131   :  { %v310_v55 = vadd.f32 %v309_v51, %v304_v50  ;;  %v312_v57 = vsel %vm216_vm0, %v306_v53, 0.0 }
 0x133   :  { %v311_v56 = vadd.f32 %v310_v55, %v305_v54 }
 0x135   :  { %v313_v58 = vadd.f32 %v312_v57, %v311_v56 }
 0x137   :  { %v314_v59 = vrot.slane %v313_v58, 4 }
 0x139   :  { %v315_v60 = vadd.f32 %v314_v59, %v313_v58 }
 0x13b   :  { %v316_v61 = vrot.slane %v315_v60, 2 }
 0x13d   :  { %v317_v62 = vadd.f32 %v316_v61, %v315_v60 }
 0x13f   :  { %v318_v0 = vrot.slane %v317_v62, 1 }
 0x141   :  { %v319_v2 = vadd.f32 %v318_v0, %v317_v62 }
 0x143   :  { %v326_v3 = vadd.f32 %v325_v1, %v319_v2 }
 0x145   :  { %327 = vst [vmem:[%s540_s7] sm:$0x1] %v326_v3 }

</bundles_post_ra>
